<compile_context>
chip_gen: v7x
topology: tpu7x:2x2x1
jax: 0.10.0
libtpu: 0.0.40
codegen_flags: <defaults>
</compile_context>

<pallas_src>
import functools

import jax
import jax.numpy as jnp
from jax.experimental import pallas as pl
from jax.experimental.pallas import tpu as pltpu


def _quantize_kernel(x_ref, embed_ref, embed_t_ref, neg_half_e2_ref,
                     q_ref, ind_ref, sse_ref, *, n_valid):
    i = pl.program_id(0)

    x = x_ref[...]                        # (T, dim) f32
    e = embed_ref[...]                    # (dim, n_embed) f32
    e_t = embed_t_ref[...]                # (n_embed, dim) f32 (transpose hoisted)
    neg_half_e2 = neg_half_e2_ref[...]    # (1, n_embed) f32 = -0.5 * ||e_j||^2

    tile_rows = x.shape[0]
    n_embed = e.shape[1]

    # argmin_j ||x - e_j||^2 == argmax_j ( x . e_j - 0.5 * ||e_j||^2 )
    # (the per-row ||x||^2 term is constant over j and dropped; no negation).
    score = jnp.dot(x, e, preferred_element_type=jnp.float32) + neg_half_e2
    ind = jnp.argmax(score, axis=1).astype(jnp.int32)          # (T,)

    # Codebook gather as one-hot @ embed^T (MXU friendly; exact, one nonzero
    # per row).  TODO(synk): if dim < 128 the q store is lane-masked; a
    # wrapper-side (N/k, k*dim) repack would make it lane-dense.
    onehot = (jax.lax.broadcasted_iota(jnp.int32, (tile_rows, n_embed), 1)
              == ind[:, None]).astype(jnp.float32)             # (T, n_embed)
    q = jnp.dot(onehot, e_t, preferred_element_type=jnp.float32)   # (T, dim)
    q_ref[...] = q.astype(q_ref.dtype)

    # Lane-dense index store.
    ind_ref[...] = ind.reshape(1, 1, tile_rows)

    # Per-tile partial sum of squared error; padded rows masked out.  The
    # cross-tile sum and the mean normalization happen in the wrapper, which
    # keeps the grid axis fully parallel.
    row_ids = i * tile_rows + jax.lax.broadcasted_iota(
        jnp.int32, (tile_rows, 1), 0)
    valid = (row_ids < n_valid).astype(jnp.float32)            # (T, 1)
    d = (q - x) * valid
    sse = jnp.sum(d * d)
    sse_ref[...] = jnp.zeros(sse_ref.shape, jnp.float32) + sse


def quantize_forward(x, embed, *, tile_rows=512):
    """x: (B, H, W, dim) float32; embed: (dim, n_embed) float32.

    Returns (quantize, diff, embed_ind) with the same semantics as the
    PyTorch Quantize.forward in eval mode.
    """
    B, H, W, dim = x.shape
    dim_e, n_embed = embed.shape
    assert dim == dim_e
    N = B * H * W

    # tile_rows must be a multiple of 128 so the index output is lane-dense.
    tile_rows = max(128, (tile_rows // 128) * 128)
    num_tiles = int(pl.cdiv(N, tile_rows))
    n_pad = num_tiles * tile_rows

    flat = x.reshape(N, dim).astype(jnp.float32)
    if n_pad != N:
        flat = jnp.pad(flat, ((0, n_pad - N), (0, 0)))

    # Grid-invariant precomputation (resident inputs, DMA'd once per tile
    # window but never recomputed per grid step).
    embed_f32 = embed.astype(jnp.float32)            # (dim, n_embed)
    embed_t = embed_f32.T                            # (n_embed, dim)
    neg_half_e2 = -0.5 * jnp.sum(embed_f32 * embed_f32, axis=0, keepdims=True)

    kernel = functools.partial(_quantize_kernel, n_valid=N)

    q_flat, ind_tiles, sse_tiles = pl.pallas_call(
        kernel,
        out_shape=(
            jax.ShapeDtypeStruct((n_pad, dim), jnp.float32),
            jax.ShapeDtypeStruct((num_tiles, 1, tile_rows), jnp.int32),
            jax.ShapeDtypeStruct((num_tiles, 1, 128), jnp.float32),
        ),
        grid_spec=pltpu.PrefetchScalarGridSpec(
            num_scalar_prefetch=0,
            grid=(num_tiles,),
            in_specs=[
                pl.BlockSpec((tile_rows, dim), lambda i: (i, 0)),
                pl.BlockSpec((dim, n_embed), lambda i: (0, 0)),
                pl.BlockSpec((n_embed, dim), lambda i: (0, 0)),
                pl.BlockSpec((1, n_embed), lambda i: (0, 0)),
            ],
            out_specs=[
                pl.BlockSpec((tile_rows, dim), lambda i: (i, 0)),
                pl.BlockSpec((1, 1, tile_rows), lambda i: (i, 0, 0)),
                pl.BlockSpec((1, 1, 128), lambda i: (i, 0, 0)),
            ],
        ),
        compiler_params=pltpu.CompilerParams(
            dimension_semantics=("parallel",)),
        cost_estimate=pl.CostEstimate(
            flops=4 * n_pad * dim * n_embed,
            transcendentals=0,
            bytes_accessed=(2 * n_pad * dim + 2 * dim * n_embed
                            + n_pad + num_tiles * 128) * 4),
    )(flat, embed_f32, embed_t, neg_half_e2)

    quantize = q_flat[:N].reshape(B, H, W, dim)
    embed_ind = ind_tiles.reshape(-1)[:N].reshape(B, H, W)
    diff = jnp.sum(sse_tiles[:, 0, 0]) / jnp.float32(N * dim)

    # Straight-through estimator (forward value == quantize).
    quantize = x + jax.lax.stop_gradient(quantize - x)
    return quantize, diff, embed_ind


def _reference(x, embed):
    B, H, W, dim = x.shape
    flat = x.reshape(-1, dim)
    dist = (jnp.sum(flat ** 2, axis=1, keepdims=True)
            - 2.0 * jnp.dot(flat, embed, precision=jax.lax.Precision.HIGHEST)
            + jnp.sum(embed ** 2, axis=0, keepdims=True))
    ind = jnp.argmax(-dist, axis=1)
    q = embed.T[ind].reshape(B, H, W, dim)
    diff = jnp.mean((q - x) ** 2)
    return q, diff, ind.reshape(B, H, W)


if __name__ == "__main__":
    key = jax.random.PRNGKey(0)
    k_x, k_e = jax.random.split(key)

    # B*H*W = 320 rows: not a multiple of the tile -> exercises padding/masking
    # and a multi-step parallel grid.
    B, H, W = 2, 10, 16
    dim, n_embed = 64, 128

    x = jax.random.normal(k_x, (B, H, W, dim), dtype=jnp.float32)
    embed = jax.random.normal(k_e, (dim, n_embed), dtype=jnp.float32)  # torch.randn(dim, n_embed)

    quantize, diff, embed_ind = quantize_forward(x, embed, tile_rows=128)
    jax.block_until_ready((quantize, diff, embed_ind))

    q_ref, diff_ref, ind_ref = _reference(x, embed)
    assert jnp.all(embed_ind == ind_ref), "index mismatch vs reference"
    assert jnp.allclose(quantize, q_ref, atol=1e-4, rtol=1e-4)
    assert jnp.allclose(diff, diff_ref, atol=1e-5, rtol=1e-4)

    print("KERNEL_OK")
</pallas_src>

<mosaic_0001>
module attributes {stable_mosaic.version = 11 : i64} {
  func.func @_quantize_kernel(%arg0: i32, %arg1: memref<128x64xf32, #tpu.memory_space<vmem>>, %arg2: memref<64x128xf32, #tpu.memory_space<vmem>>, %arg3: memref<128x64xf32, #tpu.memory_space<vmem>>, %arg4: memref<1x128xf32, #tpu.memory_space<vmem>>, %arg5: memref<128x64xf32, #tpu.memory_space<vmem>>, %arg6: memref<1x1x128xi32, #tpu.memory_space<vmem>>, %arg7: memref<1x1x128xf32, #tpu.memory_space<vmem>>) attributes {dimension_semantics = [#tpu.dimension_semantics<parallel>], iteration_bounds = array<i64: 3>, scalar_prefetch = 0 : i64, scratch_operands = 0 : i64, tpu.core_type = #tpu.core_type<tc>, window_params = [{transform_indices = @transform_0, window_bounds = array<i64: 128, 64>}, {pipeline_mode = #tpu.pipeline_mode<synchronous>, transform_indices = @transform_1, window_bounds = array<i64: 64, 128>}, {pipeline_mode = #tpu.pipeline_mode<synchronous>, transform_indices = @transform_2, window_bounds = array<i64: 128, 64>}, {pipeline_mode = #tpu.pipeline_mode<synchronous>, transform_indices = @transform_3, window_bounds = array<i64: 1, 128>}, {transform_indices = @transform_4, window_bounds = array<i64: 128, 64>}, {transform_indices = @transform_5, window_bounds = array<i64: 1, 1, 128>}, {transform_indices = @transform_6, window_bounds = array<i64: 1, 1, 128>}]} {
    %c0 = arith.constant 0 : index
    %c0_0 = arith.constant 0 : index
    %0 = vector.load %arg1[%c0, %c0_0] : memref<128x64xf32, #tpu.memory_space<vmem>>, vector<128x64xf32>
    %c0_1 = arith.constant 0 : index
    %c0_2 = arith.constant 0 : index
    %1 = vector.load %arg2[%c0_1, %c0_2] : memref<64x128xf32, #tpu.memory_space<vmem>>, vector<64x128xf32>
    %c0_3 = arith.constant 0 : index
    %c0_4 = arith.constant 0 : index
    %2 = vector.load %arg3[%c0_3, %c0_4] : memref<128x64xf32, #tpu.memory_space<vmem>>, vector<128x64xf32>
    %c0_5 = arith.constant 0 : index
    %c0_6 = arith.constant 0 : index
    %3 = vector.load %arg4[%c0_5, %c0_6] : memref<1x128xf32, #tpu.memory_space<vmem>>, vector<1x128xf32>
    %cst = arith.constant dense<0.000000e+00> : vector<128x128xf32>
    %4 = tpu.matmul %0, %1, %cst {dimension_numbers = #tpu.dot_dimension_numbers<[1], [0], [0], [1], [0, 0, 1, 1], [], []>} : vector<128x64xf32>, vector<64x128xf32>, vector<128x128xf32> -> vector<128x128xf32>
    %5 = vector.broadcast %3 : vector<1x128xf32> to vector<128x128xf32>
    %6 = arith.addf %4, %5 : vector<128x128xf32>
    %7 = tpu.reduce_index %6 {axis = 1 : i32, kind = #tpu.reduction_kind<arg_max>} : vector<128x128xf32> -> vector<128xi32>
    %8 = tpu.iota {dimensions = array<i32: 1>} : vector<128x128xi32>
    %9 = vector.shape_cast %7 : vector<128xi32> to vector<128x1xi32>
    %10 = vector.broadcast %9 : vector<128x1xi32> to vector<128x128xi32>
    %11 = arith.cmpi eq, %8, %10 : vector<128x128xi32>
    %12 = arith.extui %11 : vector<128x128xi1> to vector<128x128xi32>
    %13 = arith.sitofp %12 : vector<128x128xi32> to vector<128x128xf32>
    %cst_7 = arith.constant dense<0.000000e+00> : vector<128x64xf32>
    %14 = tpu.matmul %13, %2, %cst_7 {dimension_numbers = #tpu.dot_dimension_numbers<[1], [0], [0], [1], [0, 0, 1, 1], [], []>} : vector<128x128xf32>, vector<128x64xf32>, vector<128x64xf32> -> vector<128x64xf32>
    %c0_8 = arith.constant 0 : index
    %c0_9 = arith.constant 0 : index
    %15 = vector.load %arg5[%c0_8, %c0_9] : memref<128x64xf32, #tpu.memory_space<vmem>>, vector<128x64xf32>
    tpu.vector_store %arg5[%c0_8, %c0_9], %14 {strides = array<i32>} : memref<128x64xf32, #tpu.memory_space<vmem>>, vector<128x64xf32>,
    %16 = vector.shape_cast %7 : vector<128xi32> to vector<1x1x128xi32>
    %c0_10 = arith.constant 0 : index
    %c0_11 = arith.constant 0 : index
    %c0_12 = arith.constant 0 : index
    %17 = vector.load %arg6[%c0_10, %c0_11, %c0_12] : memref<1x1x128xi32, #tpu.memory_space<vmem>>, vector<1x1x128xi32>
    tpu.vector_store %arg6[%c0_10, %c0_11, %c0_12], %16 {strides = array<i32>} : memref<1x1x128xi32, #tpu.memory_space<vmem>>, vector<1x1x128xi32>,
    %c128_i32 = arith.constant 128 : i32
    %18 = arith.muli %arg0, %c128_i32 : i32
    %19 = tpu.iota {dimensions = array<i32: 0>} : vector<128x1xi32>
    %20 = vector.broadcast %18 : i32 to vector<128x1xi32>
    %21 = arith.addi %20, %19 : vector<128x1xi32>
    %c320_i32 = arith.constant 320 : i32
    %22 = vector.broadcast %c320_i32 : i32 to vector<128x1xi32>
    %23 = arith.cmpi slt, %21, %22 : vector<128x1xi32>
    %24 = arith.extui %23 : vector<128x1xi1> to vector<128x1xi32>
    %25 = arith.sitofp %24 : vector<128x1xi32> to vector<128x1xf32>
    %26 = arith.subf %14, %0 : vector<128x64xf32>
    %27 = vector.broadcast %25 : vector<128x1xf32> to vector<128x64xf32>
    %28 = arith.mulf %26, %27 : vector<128x64xf32>
    %29 = arith.mulf %28, %28 : vector<128x64xf32>
    %30 = vector.shape_cast %29 : vector<128x64xf32> to vector<1x128x64xf32>
    %cst_13 = arith.constant dense<0.000000e+00> : vector<1xf32>
    %31 = vector.multi_reduction <add>, %30, %cst_13 [1, 2] : vector<1x128x64xf32> to vector<1xf32>
    %32 = vector.shape_cast %31 : vector<1xf32> to vector<1x1x1xf32>
    %33 = vector.extract %32[0, 0, 0] : f32 from vector<1x1x1xf32>
    %cst_14 = arith.constant 0.000000e+00 : f32
    %34 = vector.broadcast %cst_14 : f32 to vector<1x1x128xf32>
    %35 = vector.broadcast %33 : f32 to vector<1x1x128xf32>
    %36 = arith.addf %34, %35 : vector<1x1x128xf32>
    %c0_15 = arith.constant 0 : index
    %c0_16 = arith.constant 0 : index
    %c0_17 = arith.constant 0 : index
    %37 = vector.load %arg7[%c0_15, %c0_16, %c0_17] : memref<1x1x128xf32, #tpu.memory_space<vmem>>, vector<1x1x128xf32>
    tpu.vector_store %arg7[%c0_15, %c0_16, %c0_17], %36 {strides = array<i32>} : memref<1x1x128xf32, #tpu.memory_space<vmem>>, vector<1x1x128xf32>,
    return
  }
  func.func @transform_0(%arg0: i32) -> (i32, i32) {
    %c0_i32 = arith.constant 0 : i32
    %c0_i32_0 = arith.constant 0 : i32
    return %arg0, %c0_i32 : i32, i32
  }
  func.func @transform_1(%arg0: i32) -> (i32, i32) {
    %c0_i32 = arith.constant 0 : i32
    %c0_i32_0 = arith.constant 0 : i32
    %c0_i32_1 = arith.constant 0 : i32
    return %c0_i32, %c0_i32_0 : i32, i32
  }
  func.func @transform_2(%arg0: i32) -> (i32, i32) {
    %c0_i32 = arith.constant 0 : i32
    %c0_i32_0 = arith.constant 0 : i32
    %c0_i32_1 = arith.constant 0 : i32
    return %c0_i32, %c0_i32_0 : i32, i32
  }
  func.func @transform_3(%arg0: i32) -> (i32, i32) {
    %c0_i32 = arith.constant 0 : i32
    %c0_i32_0 = arith.constant 0 : i32
    %c0_i32_1 = arith.constant 0 : i32
    return %c0_i32, %c0_i32_0 : i32, i32
  }
  func.func @transform_4(%arg0: i32) -> (i32, i32) {
    %c0_i32 = arith.constant 0 : i32
    %c0_i32_0 = arith.constant 0 : i32
    return %arg0, %c0_i32 : i32, i32
  }
  func.func @transform_5(%arg0: i32) -> (i32, i32, i32) {
    %c0_i32 = arith.constant 0 : i32
    %c0_i32_0 = arith.constant 0 : i32
    %c0_i32_1 = arith.constant 0 : i32
    return %arg0, %c0_i32, %c0_i32_0 : i32, i32, i32
  }
  func.func @transform_6(%arg0: i32) -> (i32, i32, i32) {
    %c0_i32 = arith.constant 0 : i32
    %c0_i32_0 = arith.constant 0 : i32
    %c0_i32_1 = arith.constant 0 : i32
    return %arg0, %c0_i32, %c0_i32_0 : i32, i32, i32
  }
}

</mosaic_0001>

<bundles_post_ra>
// kernel: tpu_custom_call.1
= control target key start
LH: loop header
LB: loop body
LE: loop exit
PB: predicated region body
PF: predicated region fallthrough
CT: control target
= control target key end

     0   :  { %12 = vsyncpa [#allocation3], 0  ;;  %s2161_s0 = inlined_call_operand.vmem [shape: f32[384,64], index: 0, kind: input, shape index: {}]   ;;  %s2162_s1 = inlined_call_operand.vmem [shape: f32[64,128], index: 1, kind: input, shape index: {}]   ;;  %s2163_s2 = inlined_call_operand.vmem [shape: f32[128,64], index: 2, kind: input, shape index: {}]   ;;  %s2164_s3 = inlined_call_operand.vmem [shape: f32[1,128], index: 3, kind: input, shape index: {}]   ;;  %s2165_s4 = inlined_call_operand.vmem [shape: f32[384,64], index: 4, kind: output, shape index: {0}]   ;;  %s2166_s5 = inlined_call_operand.hbm [shape: s32[3,1,128], index: 5, kind: output, shape index: {1}]   ;;  %s2167_s6 = inlined_call_operand.hbm [shape: f32[3,1,128], index: 6, kind: output, shape index: {2}]  }
   0x1   :  { %14 = vsyncpa [#allocation3 + $0x1], 0 }
   0x2   :  { %15 = vsyncpa [#allocation5], 0 }
   0x3   :  { %17 = vsyncpa [#allocation5 + $0x1], 0  ;;  %s1666_s21 = smov 0   ;;  %s1668_s22 = smov 0  }
   0x4   :  { %s1670_s23 = smov 0   ;;  %s1672_s24 = smov 0  }
   0x5 LB: > { %s1687_s25 = sadd.s32 4294967295, %s1625_s24   ;;  %s1189_s26 = sadd.s32 4294967294, %s1625_s24   ;;  %s1625_s24 = sphi %s1672_s24, %s2173_s24   ;;  %s1621_s23 = sphi %s1670_s23, %s2172_s23   ;;  %s1617_s22 = sphi %s1668_s22, %s2171_s22   ;;  %s1613_s21 = sphi %s1666_s21, %s2170_s21  }
   0x6   : > { %s1691_s27 = sadd.s32 1, %s1625_s24   ;;  %s145_s28 = sadd.s32 1, %s1621_s23 }
   0x7   : > { %s142_s29 = ssub.s32 %s1625_s24, %s1691_s27  ;;  %p155_p0 = scmp.ne.s32.totalorder %s1621_s23, %s1617_s22 }
   0x8   : > { %p143_p1 = scmp.eq.s32.totalorder %s142_s29, 0  ;;  %p156_p2 = scmp.eq.s32.totalorder %s1687_s25, 2 }
   0x9   : > { %p161_p3 = scmp.ne.s32.totalorder %s1617_s22, %s1613_s21  ;;  %p162_p4 = scmp.eq.s32.totalorder %s1189_s26, 2 }
   0xa   : > { %s1702_s30 = scalar_select %p143_p1, %s1621_s23, %s145_s28  }
   0xb   : > { %p1704_p5 = por %p156_p2, %p155_p0  ;;  %p1708_p6 = por %p162_p4, %p161_p3 }
   0xc   : > { %p1192_p7 = scmp.ge.s32.totalorder %s1625_s24, 1  ;;  %p224_p8 = scmp.lt.s32.totalorder %s1625_s24, 4 }
   0xe   : > { %p225_p9 = pnand %p1192_p7, %p224_p8 }
   0xf   : > { %v290_v0 = vld [vmem:[%s2162_s1] sm:$0xff] (!%p225_p9)  ;;  %v291_v1 = vld [vmem:[%s2162_s1 + $0x8] sm:$0xff] (!%p225_p9)  ;;  %v292_v2 = vld [vmem:[%s2162_s1 + $0x10] sm:$0xff] (!%p225_p9)  ;;  %s1724_s15 = sshll.u32 (!%p225_p9), %s1687_s25, 4  ;;  %vm321_vm0 = vcmask (!%p225_p9), 523264   ;;  %vm767_vm2 = vcmask (!%p225_p9), 130112  }
  0x10   : > { %228 = sbr.rel (%p225_p9) target bundleno = 867 (0x363), region = 36  ;;  %v1419_v3 = vpack.c.bf16 (!%p225_p9), %v291_v1, %v290_v0  ;;  %v293_v4 = vld [vmem:[%s2162_s1 + $0x18] sm:$0xff] (!%p225_p9)  ;;  %p263_p10 = scmp.lt.s32.totalorder (!%p225_p9), %s1724_s15, 47  ;;  %v294_v6 = vld [vmem:[%s2162_s1 + $0x20] sm:$0xff] (!%p225_p9)  ;;  %v295_v7 = vld [vmem:[%s2162_s1 + $0x28] sm:$0xff] (!%p225_p9)  ;;  %vm774_vm5 = vcmask (!%p225_p9), 195712  }
  0x11   : > { %v1423_v5 = vpack.c.bf16 (!%p225_p9), %v293_v4, %v292_v2  ;;  %v1427_v8 = vpack.c.bf16 (!%p225_p9), %v295_v7, %v294_v6  ;;  %v296_v9 = vld [vmem:[%s2162_s1 + $0x30] sm:$0xff] (!%p225_p9)  ;;  %v297_v10 = vld [vmem:[%s2162_s1 + $0x38] sm:$0xff] (!%p225_p9)  ;;  %v298_v28 = vld [vmem:[%s2163_s2] sm:$0xff] (!%p225_p9)  ;;  %vm781_vm6 = vcmask (!%p225_p9), 261312   ;;  %vm788_vm9 = vcmask (!%p225_p9), 326912   ;;  %s1950_s14 = sand.u32 (!%p225_p9), 1, %s1617_s22   ;;  %s2093_s26 = scalar_lea.hbm (!%p225_p9), %s2166_s5, %s1724_s15 }
  0x12   : > { %1420 = vmatprep.subr.bf16.mxu0 (!%p225_p9), %v1419_v3  ;;  %v1431_v12 = vpack.c.bf16 (!%p225_p9), %v297_v10, %v296_v9  ;;  %v299_v29 = vld [vmem:[%s2163_s2 + $0x8] sm:$0xff] (!%p225_p9)  ;;  %v300_v30 = vld [vmem:[%s2163_s2 + $0x10] sm:$0xff] (!%p225_p9)  ;;  %v301_v32 = vld [vmem:[%s2163_s2 + $0x18] sm:$0xff] (!%p225_p9)  ;;  %vm795_vm10 = vcmask (!%p225_p9), 392512   ;;  %vm802_vm13 = vcmask (!%p225_p9), 458112   ;;  %vm809_vm14 = vcmask (!%p225_p9), 523712  }
  0x13   : > { %1422 = vmatpush3.bf16.msra.mxu0 (!%p225_p9), %v1419_v3  ;;  %v1435_v31 = vpack.c.bf16 (!%p225_p9), %v299_v29, %v298_v28  ;;  %v1439_v33 = vpack.c.bf16 (!%p225_p9), %v301_v32, %v300_v30  ;;  %v302_v34 = vld [vmem:[%s2163_s2 + $0x20] sm:$0xff] (!%p225_p9)  ;;  %v303_v35 = vld [vmem:[%s2163_s2 + $0x28] sm:$0xff] (!%p225_p9)  ;;  %v304_v37 = vld [vmem:[%s2163_s2 + $0x30] sm:$0xff] (!%p225_p9)  ;;  %s1246_s17 = sshll.u32 (!%p225_p9), %s1687_s25, 7  ;;  %s1048_s9 = scalar_lea.sflag (!%p225_p9), [#allocation3], %s1950_s14 }
  0x14   : > { %1424 = vmatprep.subr.bf16.mxu0 (!%p225_p9), %v1423_v5  ;;  %v1443_v36 = vpack.c.bf16 (!%p225_p9), %v303_v35, %v302_v34  ;;  %v305_v38 = vld [vmem:[%s2163_s2 + $0x38] sm:$0xff] (!%p225_p9)  ;;  %v306_v40 = vld [vmem:[%s2163_s2 + $0x40] sm:$0xff] (!%p225_p9)  ;;  %v307_v41 = vld [vmem:[%s2163_s2 + $0x48] sm:$0xff] (!%p225_p9)  ;;  %s1629_s11 = smov (!%p225_p9), [#allocation2]  }
  0x15   : > { %1467 = vmatprep.subr.bf16.mxu1 (!%p225_p9), %v1435_v31  ;;  %v1447_v39 = vpack.c.bf16 (!%p225_p9), %v305_v38, %v304_v37  ;;  %v1451_v42 = vpack.c.bf16 (!%p225_p9), %v307_v41, %v306_v40  ;;  %v308_v43 = vld [vmem:[%s2163_s2 + $0x50] sm:$0xff] (!%p225_p9)  ;;  %v309_v44 = vld [vmem:[%s2163_s2 + $0x58] sm:$0xff] (!%p225_p9)  ;;  %v310_v46 = vld [vmem:[%s2163_s2 + $0x60] sm:$0xff] (!%p225_p9)  ;;  %v547_v37 = vlaneseq (!%p225_p9)  ;;  %s1535_s12 = sshll.u32 (!%p225_p9), %s1629_s11, 4  ;;  %s1536_s12 = int_to_ptr.vmem [resolvable:$false] %s1535_s12 }
  0x16   : > { %1475 = vmatpush3.bf16.msra.mxu1 (!%p225_p9), %v1435_v31  ;;  %v1455_v45 = vpack.c.bf16 (!%p225_p9), %v309_v44, %v308_v43  ;;  %v311_v47 = vld [vmem:[%s2163_s2 + $0x68] sm:$0xff] (!%p225_p9)  ;;  %v1197_v49 = vld [vmem:[%s2164_s3] ss:$0 sm:$0xff] (!%p225_p9)  ;;  %v312_v2 = vld [vmem:[%s2163_s2 + $0x70] sm:$0xff] (!%p225_p9)  ;;  %s1537_s13 = scalar_lea.vmem (!%p225_p9), %s1536_s12, 32 }
  0x17   : > { %s1737_s28 = scalar_select %p263_p10, %s1724_s15, 47  ;;  %1426 = vmatpush3.bf16.msra.mxu0 %v1423_v5  ;;  %1468 = vmatprep.subr.bf16.mxu1 %v1439_v33  ;;  %v1459_v48 = vpack.c.bf16 %v311_v47, %v310_v46  ;;  %v313_v3 = vld [vmem:[%s2163_s2 + $0x78] sm:$0xff]  ;;  %v1884_v38 = vand.u32 127, %v547_v37  ;;  %v1627_v46 = vmov 1.0  }
  0x18   : > { %1428 = vmatprep.subr.bf16.mxu0 %v1427_v8  ;;  %v1463_v5 = vpack.c.bf16 %v313_v3, %v312_v2 }
  0x19   : > { %s1194_s29 = sshll.u32 %s1737_s28, 3  ;;  %v762_v40 = vadd.s32 4294967288, %v1884_v38  ;;  %v769_v41 = vadd.s32 4294967280, %v1884_v38  ;;  %v776_v43 = vadd.s32 4294967272, %v1884_v38  ;;  %v811_v3 = vadd.s32 4294967232, %v1884_v38 }
  0x1a   : > { %s1751_s16 = scalar_lea.vmem %s2161_s0, %s1194_s29  ;;  %1476 = vmatpush3.bf16.msra.mxu1 %v1439_v33  ;;  %s1977_s19 = scalar_lea.vmem %s2165_s4, %s1194_s29 }
  0x1b   : > { %v1754_v11 = vld [vmem:[%s1751_s16] sm:$0xff]  ;;  %1430 = vmatpush3.bf16.msra.mxu0 %v1427_v8  ;;  %v1759_v13 = vld [vmem:[%s1751_s16 + $0x8] sm:$0xff]  ;;  %v1762_v14 = vld [vmem:[%s1751_s16 + $0x10] sm:$0xff]  ;;  %1469 = vmatprep.subr.bf16.mxu1 %v1443_v36 }
  0x1c   : > { %1339 = vmatprep.mubr.msk.f32.mxu0 %vm321_vm0, %v1754_v11  ;;  %1432 = vmatprep.subr.bf16.mxu0 %v1431_v12  ;;  %v1769_v15 = vld [vmem:[%s1751_s16 + $0x18] sm:$0xff]  ;;  %v1772_v16 = vld [vmem:[%s1751_s16 + $0x20] sm:$0xff]  ;;  %v1779_v17 = vld [vmem:[%s1751_s16 + $0x28] sm:$0xff] }
  0x1d   : > { %v1782_v18 = vld [vmem:[%s1751_s16 + $0x30] sm:$0xff]  ;;  %v1789_v19 = vld [vmem:[%s1751_s16 + $0x38] sm:$0xff]  ;;  %v1792_v20 = vld [vmem:[%s1751_s16 + $0x40] sm:$0xff] }
  0x1e   : > { %v1799_v21 = vld [vmem:[%s1751_s16 + $0x48] sm:$0xff]  ;;  %v1802_v22 = vld [vmem:[%s1751_s16 + $0x50] sm:$0xff]  ;;  %v1809_v23 = vld [vmem:[%s1751_s16 + $0x58] sm:$0xff]  ;;  %1477 = vmatpush3.bf16.msra.mxu1 %v1443_v36 }
  0x1f   : > { %1434 = vmatpush3.bf16.msra.mxu0 %v1431_v12  ;;  %v1812_v24 = vld [vmem:[%s1751_s16 + $0x60] sm:$0xff]  ;;  %v1819_v25 = vld [vmem:[%s1751_s16 + $0x68] sm:$0xff]  ;;  %v1822_v26 = vld [vmem:[%s1751_s16 + $0x70] sm:$0xff]  ;;  %1470 = vmatprep.subr.bf16.mxu1 %v1447_v39 }
  0x20   : > { %v1829_v27 = vld [vmem:[%s1751_s16 + $0x78] sm:$0xff]  ;;  %1436 = vmatprep.subr.bf16.mxu0 %v1435_v31  ;;  %s255_s16 = scalar_lea.vmem [#allocation2], %s1950_s14 }
  0x21   : > { %s1068_s28 = sshll.u32 %s255_s16, 4  ;;  %s1069_s28 = int_to_ptr.vmem [resolvable:$true] %s1068_s28 }
  0x22   : > { %1340 = vmatmul.mubr.msk.f32.vlgmr.msra.gmra.mrb[0].mxu0 %vm321_vm0, %v1759_v13  ;;  %1478 = vmatpush3.bf16.msra.mxu1 %v1447_v39  ;;  %s1531_s10 = scalar_lea.vmem %s1069_s28, 16  ;;  %p1538_p0 = scmp.lt.s32.totalorder %s1069_s28, %s1536_s12 }
  0x23   : > { %1342 = vmatprep.mubr.msk.f32.mxu0 %vm321_vm0, %v1762_v14  ;;  %1438 = vmatpush3.bf16.msra.mxu0 %v1435_v31  ;;  %p1532_p11 = scmp.ne.s32.totalorder %s1069_s28, %s1531_s10  ;;  %p1539_p1 = scmp.lt.s32.totalorder %s1537_s13, %s1531_s10 }
  0x24   : > { %1440 = vmatprep.subr.bf16.mxu0 %v1439_v33  ;;  %1471 = vmatprep.subr.bf16.mxu1 %v1451_v42 }
  0x25   : > { %p1533_p12 = pnand %p1532_p11, %p1704_p5  ;;  %p1540_p2 = por %p1539_p1, %p1538_p0 }
  0x26   : > { %1343 = vmatmul.mubr.msk.f32.gmra.mrb[2].mxu0 %vm321_vm0, %v1769_v15  ;;  %1479 = vmatpush3.bf16.msra.mxu1 %v1451_v42 }
  0x27   : > { %1345 = vmatprep.mubr.msk.f32.mxu0 %vm321_vm0, %v1772_v16  ;;  %1442 = vmatpush3.bf16.msra.mxu0 %v1439_v33  ;;  %p1534_p13 = pneg %p1533_p12 }
  0x28   : > { %1444 = vmatprep.subr.bf16.mxu0 %v1443_v36  ;;  %1472 = vmatprep.subr.bf16.mxu1 %v1455_v45 }
  0x29   : > { %p1541_p3 = pnand %p1540_p2, %p1534_p13 }
  0x2a   : > { %1346 = vmatmul.mubr.msk.f32.gmra.mrb[4].mxu0 %vm321_vm0, %v1779_v17  ;;  %1480 = vmatpush3.bf16.msra.mxu1 %v1455_v45 }
  0x2b   : > { %1348 = vmatprep.mubr.msk.f32.mxu0 %vm321_vm0, %v1782_v18  ;;  %1446 = vmatpush3.bf16.msra.mxu0 %v1443_v36 }
  0x2c   : > { %1448 = vmatprep.subr.bf16.mxu0 %v1447_v39  ;;  %1473 = vmatprep.subr.bf16.mxu1 %v1459_v48 }
  0x2e   : > { %1349 = vmatmul.mubr.msk.f32.gmra.mrb[6].mxu0 %vm321_vm0, %v1789_v19  ;;  %1481 = vmatpush3.bf16.msra.mxu1 %v1459_v48 }
  0x2f   : > { %1351 = vmatprep.mubr.msk.f32.mxu0 %vm321_vm0, %v1792_v20  ;;  %1450 = vmatpush3.bf16.msra.mxu0 %v1447_v39  ;;  %v1886_v39 = vshrl.u32 %v547_v37, 7 }
  0x30   : > { %1452 = vmatprep.subr.bf16.mxu0 %v1451_v42  ;;  %1474 = vmatprep.subr.bf16.mxu1 %v1463_v5 }
  0x31   : > { %v760_v44 = vsub.s32 %v1884_v38, %v1886_v39  ;;  %v772_v47 = vsub.s32 %v769_v41, %v1886_v39  ;;  %v839_v41 = vadd.s32 4294967200, %v1884_v38 }
  0x32   : > { %1352 = vmatmul.mubr.msk.f32.gmra.mrb[8].mxu0 %vm321_vm0, %v1799_v21  ;;  %1482 = vmatpush3.bf16.msra.mxu1 %v1463_v5 }
  0x33   : > { %1354 = vmatprep.mubr.msk.f32.mxu0 %vm321_vm0, %v1802_v22  ;;  %1454 = vmatpush3.bf16.msra.mxu0 %v1451_v42 }
  0x34   : > { %1456 = vmatprep.subr.bf16.mxu0 %v1455_v45 }
  0x36   : > { %1355 = vmatmul.mubr.msk.f32.gmra.mrb[10].mxu0 %vm321_vm0, %v1809_v23 }
  0x37   : > { %1357 = vmatprep.mubr.msk.f32.mxu0 %vm321_vm0, %v1812_v24  ;;  %1458 = vmatpush3.bf16.msra.mxu0 %v1455_v45  ;;  %v765_v45 = vsub.s32 %v762_v40, %v1886_v39 }
  0x38   : > { %1460 = vmatprep.subr.bf16.mxu0 %v1459_v48 }
  0x3a   : > { %1358 = vmatmul.mubr.msk.f32.gmra.mrb[12].mxu0 %vm321_vm0, %v1819_v25 }
  0x3b   : > { %1360 = vmatprep.mubr.msk.f32.mxu0 %vm321_vm0, %v1822_v26  ;;  %1462 = vmatpush3.bf16.msra.mxu0 %v1459_v48  ;;  %v783_v48 = vadd.s32 4294967264, %v1884_v38 }
  0x3c   : > { %1464 = vmatprep.subr.bf16.mxu0 %v1463_v5 }
  0x3e   : > { %1361 = vmatmul.mubr.msk.f32.gmra.mrb[14].mxu0 %vm321_vm0, %v1829_v27 }
  0x3f   : > { %1466 = vmatpush3.bf16.msra.mxu0 %v1463_v5 }
  0xf5   : > { %v1341_v50 = vpop.f32.mrb[0].mxu0 }
  0xf6   : > { %v436_v51 = vpop.f32.mrb[1].mxu0  ;;  %v442_v55 = vadd.f32 %v1341_v50, %v1197_v49 }
  0xf7   : > { %v437_v52 = vadd.f32 %v1197_v49, %v436_v51  ;;  %v779_v51 = vsub.s32 %v776_v43, %v1886_v39 }
  0xf9   : > { %v1344_v53 = vpop.f32.mrb[2].mxu0  ;;  %515 = vmax.index.xlane.f32.xlu0 %v437_v52  ;;  %v790_v52 = vadd.s32 4294967256, %v1884_v38 }
  0xfa   : > { %v446_v54 = vpop.f32.mrb[3].mxu0  ;;  %v452_v59 = vadd.f32 %v1344_v53, %v1197_v49 }
  0xfb   : > { %v447_v56 = vadd.f32 %v1197_v49, %v446_v54 }
  0xfd   : > { %519 = vmax.index.xlane.f32.xlu1 %v447_v56  ;;  %517 = vmax.index.xlane.f32.xlu0 %v442_v55  ;;  %v1347_v57 = vpop.f32.mrb[4].mxu0  ;;  %v786_v56 = vsub.s32 %v783_v48, %v1886_v39 }
  0xfe   : > { %v456_v58 = vpop.f32.mrb[5].mxu0  ;;  %v462_v63 = vadd.f32 %v1347_v57, %v1197_v49  ;;  %v797_v57 = vadd.s32 4294967248, %v1884_v38 }
  0xff   : > { %v457_v60 = vadd.f32 %v1197_v49, %v456_v58 }
 0x100   : > { %v800_v2 = vsub.s32 %v797_v57, %v1886_v39 }
 0x101   : > { %521 = vmax.index.xlane.f32.xlu1 %v452_v59  ;;  %v1350_v61 = vpop.f32.mrb[6].mxu0  ;;  %523 = vmax.index.xlane.f32.xlu0 %v457_v60 }
 0x102   : > { %v466_v62 = vpop.f32.mrb[7].mxu0  ;;  %v472_v6 = vadd.f32 %v1350_v61, %v1197_v49  ;;  %v793_v61 = vsub.s32 %v790_v52, %v1886_v39  ;;  %v853_v52 = vadd.s32 4294967184, %v1884_v38 }
 0x103   : > { %v467_v0 = vadd.f32 %v1197_v49, %v466_v62 }
 0x105   : > { %525 = vmax.index.xlane.f32.xlu1 %v462_v63  ;;  %v1353_v1 = vpop.f32.mrb[8].mxu0  ;;  %527 = vmax.index.xlane.f32.xlu0 %v467_v0  ;;  %v804_v63 = vadd.s32 4294967240, %v1884_v38 }
 0x106   : > { %v476_v4 = vpop.f32.mrb[9].mxu0  ;;  %v482_v10 = vadd.f32 %v1353_v1, %v1197_v49 }
 0x107   : > { %v477_v7 = vadd.f32 %v1197_v49, %v476_v4 }
 0x109   : > { %529 = vmax.index.xlane.f32.xlu1 %v472_v6  ;;  %v1356_v8 = vpop.f32.mrb[10].mxu0  ;;  %531 = vmax.index.xlane.f32.xlu0 %v477_v7  ;;  %v818_v7 = vadd.s32 4294967224, %v1884_v38 }
 0x10a   : > { %v486_v9 = vpop.f32.mrb[11].mxu0  ;;  %v492_v30 = vadd.f32 %v1356_v8, %v1197_v49 }
 0x10b   : > { %v487_v12 = vadd.f32 %v1197_v49, %v486_v9  ;;  %v807_v9 = vsub.s32 %v804_v63, %v1886_v39 }
 0x10d   : > { %533 = vmax.index.xlane.f32.xlu1 %v482_v10  ;;  %v1359_v28 = vpop.f32.mrb[12].mxu0  ;;  %535 = vmax.index.xlane.f32.xlu0 %v487_v12 }
 0x10e   : > { %v496_v29 = vpop.f32.mrb[13].mxu0  ;;  %v502_v34 = vadd.f32 %v1359_v28, %v1197_v49  ;;  %v814_v28 = vsub.s32 %v811_v3, %v1886_v39 }
 0x10f   : > { %v497_v31 = vadd.f32 %v1197_v49, %v496_v29  ;;  %v825_v29 = vadd.s32 4294967216, %v1884_v38 }
 0x111   : > { %537 = vmax.index.xlane.f32.xlu1 %v492_v30  ;;  %v1362_v32 = vpop.f32.mrb[14].mxu0  ;;  %539 = vmax.index.xlane.f32.xlu0 %v497_v31  ;;  %v828_v40 = vsub.s32 %v825_v29, %v1886_v39  ;;  %v873_v29 = vadd.s32 24, %v1886_v39 }
 0x112   : > { %v506_v33 = vpop.f32.mrb[15].mxu0  ;;  %v512_v36 = vadd.f32 %v1362_v32, %v1197_v49 }
 0x113   : > { %v507_v35 = vadd.f32 %v1197_v49, %v506_v33  ;;  %v821_v33 = vsub.s32 %v818_v7, %v1886_v39 }
 0x115   : > { %541 = vmax.index.xlane.f32.xlu1 %v502_v34  ;;  %543 = vmax.index.xlane.f32.xlu0 %v507_v35  ;;  %v832_v35 = vadd.s32 4294967208, %v1884_v38 }
 0x117   : > { %v835_v48 = vsub.s32 %v832_v35, %v1886_v39  ;;  %v877_v35 = vadd.s32 56, %v1886_v39 }
 0x119   : > { %545 = vmax.index.xlane.f32.xlu1 %v512_v36 }
 0x186   : > { %v516_v42 = vpop.xlane.xlu0 %515 }
 0x187   : > { %vm549_vm1 = vcmp.eq.s32.totalorder %v1884_v38, %v516_v42  ;;  %v761_v53 = vrot.slane %v516_v42, %v760_v44 }
 0x188   : > { %1395 = vmatprep.mubr.msk.f32.mxu0 %vm549_vm1, %v1627_v46 }
 0x18a   : > { %v520_v49 = vpop.xlane.xlu1 %519  ;;  %v518_v50 = vpop.xlane.xlu0 %517 }
 0x18b   : > { %vm551_vm3 = vcmp.eq.s32.totalorder %v1884_v38, %v520_v49  ;;  %vm550_vm4 = vcmp.eq.s32.totalorder %v1884_v38, %v518_v50  ;;  %v766_v54 = vrot.slane %v518_v50, %v765_v45  ;;  %v773_v55 = vrot.slane %v520_v49, %v772_v47 }
 0x18c   : > { %1396 = vmatmul.mubr.msk.f32.vlgmr.msra.gmra.mrb[16].mxu0 %vm550_vm4, %v1627_v46  ;;  %v846_v45 = vadd.s32 4294967192, %v1884_v38 }
 0x18d   : > { %v768_v58 = vsel %vm767_vm2, %v766_v54, %v761_v53  ;;  %1398 = vmatprep.mubr.msk.f32.mxu0 %vm551_vm3, %v1627_v46  ;;  %vm816_vm2 = vcmask 589312   ;;  %vm823_vm3 = vcmask 654912  }
 0x18e   : > { %v522_v59 = vpop.xlane.xlu1 %521  ;;  %v524_v60 = vpop.xlane.xlu0 %523  ;;  %v775_v0 = vsel %vm774_vm5, %v773_v55, %v768_v58  ;;  %v860_v58 = vadd.s32 4294967176, %v1884_v38 }
 0x18f   : > { %vm552_vm7 = vcmp.eq.s32.totalorder %v1884_v38, %v522_v59  ;;  %v780_v62 = vrot.slane %v522_v59, %v779_v51  ;;  %vm553_vm8 = vcmp.eq.s32.totalorder %v1884_v38, %v524_v60  ;;  %v787_v1 = vrot.slane %v524_v60, %v786_v56 }
 0x190   : > { %1399 = vmatmul.mubr.msk.f32.gmra.mrb[18].mxu0 %vm552_vm7, %v1627_v46  ;;  %1401 = vmatprep.mubr.msk.f32.mxu1 %vm553_vm8, %v1627_v46  ;;  %v842_v51 = vsub.s32 %v839_v41, %v1886_v39  ;;  %vm837_vm7 = vcmask 786112   ;;  %v849_v56 = vsub.s32 %v846_v45, %v1886_v39 }
 0x191   : > { %v782_v4 = vsel %vm781_vm6, %v780_v62, %v775_v0  ;;  %vm830_vm6 = vcmask 720512  }
 0x192   : > { %v526_v5 = vpop.xlane.xlu1 %525  ;;  %v528_v6 = vpop.xlane.xlu0 %527  ;;  %v789_v10 = vsel %vm788_vm9, %v787_v1, %v782_v4 }
 0x193   : > { %vm554_vm11 = vcmp.eq.s32.totalorder %v1884_v38, %v526_v5  ;;  %v794_v8 = vrot.slane %v526_v5, %v793_v61  ;;  %vm555_vm12 = vcmp.eq.s32.totalorder %v1884_v38, %v528_v6  ;;  %v801_v12 = vrot.slane %v528_v6, %v800_v2 }
 0x194   : > { %1402 = vmatmul.mubr.msk.f32.vlgmr.msra.gmra.mrb[0].mxu1 %vm554_vm11, %v1627_v46  ;;  %v856_v61 = vsub.s32 %v853_v52, %v1886_v39  ;;  %vm851_vm11 = vcmask 917312   ;;  %v863_v2 = vsub.s32 %v860_v58, %v1886_v39 }
 0x195   : > { %v796_v30 = vsel %vm795_vm10, %v794_v8, %v789_v10  ;;  %1404 = vmatprep.mubr.msk.f32.mxu1 %vm555_vm12, %v1627_v46  ;;  %vm844_vm10 = vcmask 851712   ;;  %v871_v10 = vadd.s32 8, %v1886_v39 }
 0x196   : > { %v530_v31 = vpop.xlane.xlu1 %529  ;;  %v532_v32 = vpop.xlane.xlu0 %531  ;;  %v803_v36 = vsel %vm802_vm13, %v801_v12, %v796_v30  ;;  %v1960_v12 = vstv %s1246_s17 }
 0x197   : > { %vm556_vm15 = vcmp.eq.s32.totalorder %v1884_v38, %v530_v31  ;;  %v808_v34 = vrot.slane %v530_v31, %v807_v9  ;;  %vm557_vm1 = vcmp.eq.s32.totalorder %v1884_v38, %v532_v32  ;;  %v815_v37 = vrot.slane %v532_v32, %v814_v28 }
 0x198   : > { %1405 = vmatmul.mubr.msk.f32.gmra.mrb[2].mxu1 %vm556_vm15, %v1627_v46  ;;  %vm865_vm15 = vcmask 1048512   ;;  %v888_v28 = vadd.s32 %v1960_v12, %v871_v10  ;;  %v887_v30 = vadd.s32 %v1960_v12, %v1886_v39  ;;  %v890_v31 = vadd.s32 %v1960_v12, %v873_v29 }
 0x199   : > { %v810_v42 = vsel %vm809_vm14, %v808_v34, %v803_v36  ;;  %1407 = vmatprep.mubr.msk.f32.mxu1 %vm557_vm1, %v1627_v46  ;;  %vm858_vm14 = vcmask 982912   ;;  %v874_v34 = vadd.s32 32, %v1886_v39  ;;  %v1628_v36 = vmov 0.0  }
 0x19a   : > { %v534_v43 = vpop.xlane.xlu1 %533  ;;  %v536_v44 = vpop.xlane.xlu0 %535  ;;  %v817_v49 = vsel %vm816_vm2, %v815_v37, %v810_v42  ;;  %vm904_vm2 = vcmp.lt.s32.totalorder %v888_v28, 320  ;;  %v876_v42 = vadd.s32 48, %v1886_v39 }
 0x19b   : > { %vm558_vm4 = vcmp.eq.s32.totalorder %v1884_v38, %v534_v43  ;;  %v822_v47 = vrot.slane %v534_v43, %v821_v33  ;;  %vm559_vm5 = vcmp.eq.s32.totalorder %v1884_v38, %v536_v44  ;;  %v829_v50 = vrot.slane %v536_v44, %v828_v40 }
 0x19c   : > { %1408 = vmatmul.mubr.msk.f32.gmra.mrb[4].mxu1 %vm558_vm4, %v1627_v46  ;;  %v1248_v37 = vsel %vm904_vm2, 1.0, %v1628_v36  ;;  %vm906_vm4 = vcmp.lt.s32.totalorder %v890_v31, 320  ;;  %v891_v45 = vadd.s32 %v1960_v12, %v874_v34  ;;  %v882_v34 = vadd.s32 96, %v1886_v39 }
 0x19d   : > { %v824_v53 = vsel %vm823_vm3, %v822_v47, %v817_v49  ;;  %1410 = vmatprep.mubr.msk.f32.mxu1 %vm559_vm5, %v1627_v46  ;;  %vm903_vm3 = vcmp.lt.s32.totalorder %v887_v30, 320  ;;  %v879_v47 = vadd.s32 72, %v1886_v39  ;;  %v894_v49 = vadd.s32 %v1960_v12, %v877_v35 }
 0x19e   : > { %v538_v54 = vpop.xlane.xlu1 %537  ;;  %v540_v55 = vpop.xlane.xlu0 %539  ;;  %v831_v59 = vsel %vm830_vm6, %v829_v50, %v824_v53  ;;  %v1247_v41 = vsel %vm903_vm3, 1.0, %v1628_v36  ;;  %v878_v50 = vadd.s32 64, %v1886_v39  ;;  %v1250_v52 = vsel %vm906_vm4, 1.0, %v1628_v36 }
 0x19f   : > { %vm560_vm8 = vcmp.eq.s32.totalorder %v1884_v38, %v538_v54  ;;  %v836_v57 = vrot.slane %v538_v54, %v835_v48  ;;  %vm561_vm9 = vcmp.eq.s32.totalorder %v1884_v38, %v540_v55  ;;  %v843_v60 = vrot.slane %v540_v55, %v842_v51 }
 0x1a0   : > { %1411 = vmatmul.mubr.msk.f32.gmra.mrb[6].mxu1 %vm560_vm8, %v1627_v46  ;;  %vm910_vm8 = vcmp.lt.s32.totalorder %v894_v49, 320 }
 0x1a1   : > { %v838_v62 = vsel %vm837_vm7, %v836_v57, %v831_v59  ;;  %1413 = vmatprep.mubr.msk.f32.mxu1 %vm561_vm9, %v1627_v46  ;;  %vm907_vm7 = vcmp.lt.s32.totalorder %v891_v45, 320  ;;  %v896_v59 = vadd.s32 %v1960_v12, %v879_v47 }
 0x1a2   : > { %v542_v63 = vpop.xlane.xlu1 %541  ;;  %v544_v0 = vpop.xlane.xlu0 %543  ;;  %v845_v3 = vsel %vm844_vm10, %v843_v60, %v838_v62  ;;  %v895_v62 = vadd.s32 %v1960_v12, %v878_v50 }
 0x1a3   : > { %vm562_vm12 = vcmp.eq.s32.totalorder %v1884_v38, %v542_v63  ;;  %v850_v1 = vrot.slane %v542_v63, %v849_v56  ;;  %vm563_vm13 = vcmp.eq.s32.totalorder %v1884_v38, %v544_v0  ;;  %v857_v4 = vrot.slane %v544_v0, %v856_v61 }
 0x1a4   : > { %1414 = vmatmul.mubr.msk.f32.gmra.mrb[8].mxu1 %vm562_vm12, %v1627_v46  ;;  %v893_v56 = vadd.s32 %v1960_v12, %v876_v42  ;;  %vm912_vm10 = vcmp.lt.s32.totalorder %v896_v59, 320 }
 0x1a5   : > { %v852_v5 = vsel %vm851_vm11, %v850_v1, %v845_v3  ;;  %1416 = vmatprep.mubr.msk.f32.mxu1 %vm563_vm13, %v1627_v46  ;;  %v881_v1 = vadd.s32 88, %v1886_v39  ;;  %vm911_vm11 = vcmp.lt.s32.totalorder %v895_v62, 320 }
 0x1a6   : > { %v546_v6 = vpop.xlane.xlu1 %545  ;;  %v859_v8 = vsel %vm858_vm14, %v857_v4, %v852_v5  ;;  %v1251_v5 = vsel %vm907_vm7, 1.0, %v1628_v36  ;;  %vm909_vm9 = vcmp.lt.s32.totalorder %v893_v56, 320 }
 0x1a7   : > { %vm564_vm1 = vcmp.eq.s32.totalorder %v1884_v38, %v546_v6  ;;  %v864_v7 = vrot.slane %v546_v6, %v863_v2  ;;  %v872_v38 = vadd.s32 16, %v1886_v39  ;;  %v898_v30 = vadd.s32 %v1960_v12, %v881_v1 }
 0x1a8   : > { %1417 = vmatmul.mubr.msk.f32.gmra.mrb[10].mxu1 %vm564_vm1, %v1627_v46  ;;  %v875_v46 = vadd.s32 40, %v1886_v39 }
 0x1a9   : > { %v866_v9 = vsel %vm865_vm15, %v864_v7, %v859_v8  ;;  %v889_v32 = vadd.s32 %v1960_v12, %v872_v38  ;;  %v1254_v8 = vsel %vm910_vm8, 1.0, %v1628_v36  ;;  %v1253_v38 = vsel %vm909_vm9, 1.0, %v1628_v36 }
 0x1aa   : > { %867 = vst [vmem:[%s255_s16] sm:$0x1] %v866_v9  ;;  %v892_v33 = vadd.s32 %v1960_v12, %v875_v46  ;;  %vm914_vm12 = vcmp.lt.s32.totalorder %v898_v30, 320 }
 0x1ab   : > { %vm905_vm5 = vcmp.lt.s32.totalorder %v889_v32, 320 }
 0x1ac   : > { %vm908_vm6 = vcmp.lt.s32.totalorder %v892_v33, 320  ;;  %v1249_v54 = vsel %vm905_vm5, 1.0, %v1628_v36  ;;  %v883_v33 = vadd.s32 104, %v1886_v39 }
 0x1ad   : > { %v1252_v55 = vsel %vm908_vm6, 1.0, %v1628_v36 }
 0x25f   : > { %v1397_v40 = vpop.f32.mrb[16].mxu0 }
 0x260   : > { %743 = vst.msk [vmem:[%s1977_s19 + $0x8] sm:$0xff] %vm321_vm0, %v1397_v40  ;;  %v952_v43 = vsub.f32 %v1397_v40, %v1759_v13  ;;  %v663_v44 = vpop.f32.mrb[17].mxu0  ;;  %v1256_v40 = vsel %vm912_vm10, 1.0, %v1628_v36 }
 0x261   : > { %742 = vst.msk [vmem:[%s1977_s19] sm:$0xff] %vm321_vm0, %v663_v44  ;;  %v951_v48 = vsub.f32 %v663_v44, %v1754_v11 }
 0x262   : > { %v968_v51 = vmul.f32 %v1248_v37, %v952_v43 }
 0x263   : > { %v967_v13 = vmul.f32 %v1247_v41, %v951_v48  ;;  %v1400_v53 = vpop.f32.mrb[18].mxu0  ;;  %v1255_v41 = vsel %vm911_vm11, 1.0, %v1628_v36 }
 0x264   : > { %v984_v57 = vmul.f32 %v968_v51, %v968_v51  ;;  %745 = vst.msk [vmem:[%s1977_s19 + $0x18] sm:$0xff] %vm321_vm0, %v1400_v53  ;;  %v954_v11 = vsub.f32 %v1400_v53, %v1769_v15  ;;  %v673_v58 = vpop.f32.mrb[19].mxu0  ;;  %v880_v15 = vadd.s32 80, %v1886_v39  ;;  %v900_v51 = vadd.s32 %v1960_v12, %v883_v33 }
 0x265   : > { %v983_v60 = vmul.f32 %v967_v13, %v967_v13  ;;  %744 = vst.msk [vmem:[%s1977_s19 + $0x10] sm:$0xff] %vm321_vm0, %v673_v58  ;;  %v953_v61 = vsub.f32 %v673_v58, %v1762_v14 }
 0x266   : > { %v1000_v63 = vsel %vm321_vm0, %v984_v57, 0.0  ;;  %v970_v0 = vmul.f32 %v1250_v52, %v954_v11  ;;  %v899_v52 = vadd.s32 %v1960_v12, %v882_v34  ;;  %vm916_vm14 = vcmp.lt.s32.totalorder %v900_v51, 320 }
 0x267   : > { %v999_v2 = vsel %vm321_vm0, %v983_v60, 0.0  ;;  %v969_v3 = vmul.f32 %v1249_v54, %v953_v61  ;;  %v1403_v4 = vpop.f32.mrb[0].mxu1  ;;  %v1258_v61 = vsel %vm914_vm12, 1.0, %v1628_v36 }
 0x268   : > { %v1001_v6 = vadd.f32 %v1000_v63, %v999_v2  ;;  %747 = vst.msk [vmem:[%s1977_s19 + $0x28] sm:$0xff] %vm321_vm0, %v1403_v4  ;;  %v956_v14 = vsub.f32 %v1403_v4, %v1779_v17  ;;  %v683_v7 = vpop.f32.mrb[1].mxu1  ;;  %v986_v9 = vmul.f32 %v970_v0, %v970_v0  ;;  %v897_v17 = vadd.s32 %v1960_v12, %v880_v15 }
 0x269   : > { %v985_v10 = vmul.f32 %v969_v3, %v969_v3  ;;  %746 = vst.msk [vmem:[%s1977_s19 + $0x20] sm:$0xff] %vm321_vm0, %v683_v7  ;;  %v955_v28 = vsub.f32 %v683_v7, %v1772_v16  ;;  %vm915_vm15 = vcmp.lt.s32.totalorder %v899_v52, 320 }
 0x26a   : > { %v972_v29 = vmul.f32 %v1252_v55, %v956_v14  ;;  %v1004_v42 = vsel %vm321_vm0, %v986_v9, 0.0  ;;  %vm913_vm13 = vcmp.lt.s32.totalorder %v897_v17, 320  ;;  %v884_v55 = vadd.s32 112, %v1886_v39 }
 0x26b   : > { %v1002_v46 = vsel %vm321_vm0, %v985_v10, 0.0  ;;  %v971_v31 = vmul.f32 %v1251_v5, %v955_v28  ;;  %v1406_v32 = vpop.f32.mrb[2].mxu1  ;;  %v1260_v10 = vsel %vm916_vm14, 1.0, %v1628_v36 }
 0x26c   : > { %v1003_v35 = vadd.f32 %v1002_v46, %v1001_v6  ;;  %749 = vst.msk [vmem:[%s1977_s19 + $0x38] sm:$0xff] %vm321_vm0, %v1406_v32  ;;  %v958_v16 = vsub.f32 %v1406_v32, %v1789_v19  ;;  %v693_v37 = vpop.f32.mrb[3].mxu1  ;;  %v988_v43 = vmul.f32 %v972_v29, %v972_v29  ;;  %v901_v2 = vadd.s32 %v1960_v12, %v884_v55 }
 0x26d   : > { %v987_v44 = vmul.f32 %v971_v31, %v971_v31  ;;  %748 = vst.msk [vmem:[%s1977_s19 + $0x30] sm:$0xff] %vm321_vm0, %v693_v37  ;;  %v957_v45 = vsub.f32 %v693_v37, %v1782_v18  ;;  %v885_v18 = vadd.s32 120, %v1886_v39 }
 0x26e   : > { %v1005_v47 = vadd.f32 %v1004_v42, %v1003_v35  ;;  %v974_v48 = vmul.f32 %v1254_v8, %v958_v16  ;;  %v1008_v56 = vsel %vm321_vm0, %v988_v43, 0.0  ;;  %vm917_vm2 = vcmp.lt.s32.totalorder %v901_v2, 320 }
 0x26f   : > { %v1006_v19 = vsel %vm321_vm0, %v987_v44, 0.0  ;;  %v973_v49 = vmul.f32 %v1253_v38, %v957_v45  ;;  %v1409_v50 = vpop.f32.mrb[4].mxu1  ;;  %v902_v15 = vadd.s32 %v1960_v12, %v885_v18  ;;  %v1259_v12 = vsel %vm915_vm15, 1.0, %v1628_v36 }
 0x270   : > { %v1007_v13 = vadd.f32 %v1006_v19, %v1005_v47  ;;  %751 = vst.msk [vmem:[%s1977_s19 + $0x48] sm:$0xff] %vm321_vm0, %v1409_v50  ;;  %v960_v53 = vsub.f32 %v1409_v50, %v1799_v21  ;;  %v703_v54 = vpop.f32.mrb[5].mxu1  ;;  %v990_v57 = vmul.f32 %v974_v48, %v974_v48  ;;  %v1257_v21 = vsel %vm913_vm13, 1.0, %v1628_v36 }
 0x271   : > { %v989_v11 = vmul.f32 %v973_v49, %v973_v49  ;;  %750 = vst.msk [vmem:[%s1977_s19 + $0x40] sm:$0xff] %vm321_vm0, %v703_v54  ;;  %v959_v58 = vsub.f32 %v703_v54, %v1792_v20  ;;  %vm918_vm1 = vcmp.lt.s32.totalorder %v902_v15, 320 }
 0x272   : > { %v1009_v59 = vadd.f32 %v1008_v56, %v1007_v13  ;;  %v976_v60 = vmul.f32 %v1256_v40, %v960_v53  ;;  %v1012_v3 = vsel %vm321_vm0, %v990_v57, 0.0 }
 0x273   : > { %v1010_v39 = vsel %vm321_vm0, %v989_v11, 0.0  ;;  %v975_v62 = vmul.f32 %v1255_v41, %v959_v58  ;;  %v1412_v63 = vpop.f32.mrb[6].mxu1  ;;  %v1261_v41 = vsel %vm917_vm2, 1.0, %v1628_v36 }
 0x274   : > { %v1011_v0 = vadd.f32 %v1010_v39, %v1009_v59  ;;  %753 = vst.msk [vmem:[%s1977_s19 + $0x58] sm:$0xff] %vm321_vm0, %v1412_v63  ;;  %v962_v20 = vsub.f32 %v1412_v63, %v1809_v23  ;;  %v713_v1 = vpop.f32.mrb[7].mxu1  ;;  %v992_v4 = vmul.f32 %v976_v60, %v976_v60 }
 0x275   : > { %v991_v5 = vmul.f32 %v975_v62, %v975_v62  ;;  %752 = vst.msk [vmem:[%s1977_s19 + $0x50] sm:$0xff] %vm321_vm0, %v713_v1  ;;  %v961_v6 = vsub.f32 %v713_v1, %v1802_v22 }
 0x276   : > { %v1013_v14 = vadd.f32 %v1012_v3, %v1011_v0  ;;  %v978_v7 = vmul.f32 %v1258_v61, %v962_v20  ;;  %v1016_v38 = vsel %vm321_vm0, %v992_v4, 0.0 }
 0x277   : > { %v1014_v8 = vsel %vm321_vm0, %v991_v5, 0.0  ;;  %v977_v23 = vmul.f32 %v1257_v21, %v961_v6  ;;  %v1415_v9 = vpop.f32.mrb[8].mxu1 }
 0x278   : > { %v1015_v28 = vadd.f32 %v1014_v8, %v1013_v14  ;;  %755 = vst.msk [vmem:[%s1977_s19 + $0x68] sm:$0xff] %vm321_vm0, %v1415_v9  ;;  %v964_v29 = vsub.f32 %v1415_v9, %v1819_v25  ;;  %v723_v22 = vpop.f32.mrb[9].mxu1  ;;  %v994_v30 = vmul.f32 %v978_v7, %v978_v7  ;;  %v1262_v25 = vsel %vm918_vm1, 1.0, %v1628_v36 }
 0x279   : > { %v993_v17 = vmul.f32 %v977_v23, %v977_v23  ;;  %754 = vst.msk [vmem:[%s1977_s19 + $0x60] sm:$0xff] %vm321_vm0, %v723_v22  ;;  %v963_v46 = vsub.f32 %v723_v22, %v1812_v24 }
 0x27a   : > { %v1017_v31 = vadd.f32 %v1016_v38, %v1015_v28  ;;  %v980_v32 = vmul.f32 %v1260_v10, %v964_v29  ;;  %v1020_v42 = vsel %vm321_vm0, %v994_v30, 0.0 }
 0x27b   : > { %v1018_v33 = vsel %vm321_vm0, %v993_v17, 0.0  ;;  %v979_v34 = vmul.f32 %v1259_v12, %v963_v46  ;;  %v1418_v35 = vpop.f32.mrb[10].mxu1 }
 0x27c   : > { %v1019_v16 = vadd.f32 %v1018_v33, %v1017_v31  ;;  %757 = vst.msk [vmem:[%s1977_s19 + $0x78] sm:$0xff] %vm321_vm0, %v1418_v35  ;;  %v966_v37 = vsub.f32 %v1418_v35, %v1829_v27  ;;  %v733_v40 = vpop.f32.mrb[11].mxu1  ;;  %v996_v24 = vmul.f32 %v980_v32, %v980_v32 }
 0x27d   : > { %v995_v43 = vmul.f32 %v979_v34, %v979_v34  ;;  %756 = vst.msk [vmem:[%s1977_s19 + $0x70] sm:$0xff] %vm321_vm0, %v733_v40  ;;  %v965_v44 = vsub.f32 %v733_v40, %v1822_v26 }
 0x27e   : > { %v1021_v45 = vadd.f32 %v1020_v42, %v1019_v16  ;;  %v982_v47 = vmul.f32 %v1262_v25, %v966_v37  ;;  %v1024_v36 = vsel %vm321_vm0, %v996_v24, 0.0 }
 0x27f   : > { %v1022_v48 = vsel %vm321_vm0, %v995_v43, 0.0  ;;  %v981_v27 = vmul.f32 %v1261_v41, %v965_v44 }
 0x280   : > { %v1023_v19 = vadd.f32 %v1022_v48, %v1021_v45  ;;  %v998_v49 = vmul.f32 %v982_v47, %v982_v47 }
 0x281   : > { %v997_v50 = vmul.f32 %v981_v27, %v981_v27 }
 0x282   : > { %v1025_v51 = vadd.f32 %v1024_v36, %v1023_v19  ;;  %v1028_v53 = vsel %vm321_vm0, %v998_v49, 0.0 }
 0x283   : > { %v1026_v52 = vsel %vm321_vm0, %v997_v50, 0.0 }
 0x284   : > { %v1027_v13 = vadd.f32 %v1026_v52, %v1025_v51 }
 0x286   : > { %v1029_v26 = vadd.f32 %v1028_v53, %v1027_v13 }
 0x288   : > { %1030 = vadd.xlane.f32.xlu0 %v1029_v26 }
 0x289   : > { %1544 = shalt.err (!%p1541_p3)
}
 0x28a   : > { %s1545_s16 = scalar_lea.hbm %s2093_s26, 16  ;;  %s1549_s18 = scalar_lea.hbm %s2166_s5, 48 }
 0x28b   : > { %p1546_p4 = scmp.ne.s32.totalorder %s2093_s26, %s1545_s16  ;;  %p1550_p9 = scmp.lt.u32.totalorder %s2093_s26, %s2166_s5 }
 0x28c   : > { %p1551_p10 = scmp.lt.u32.totalorder %s1549_s18, %s1545_s16  ;;  %p1553_p12 = scmp.lt.u32.totalorder %s1545_s16, %s2093_s26 }
 0x28d   : > { %p1547_p7 = pnand %p1546_p4, %p1704_p5 }
 0x28e   : > { %p1552_p11 = por %p1551_p10, %p1550_p9 }
 0x28f   : > { %p1548_p8 = pneg %p1547_p7 }
 0x290   : > { %p1554_p13 = por %p1553_p12, %p1552_p11 }
 0x292   : > { %p1555_p0 = pnand %p1554_p13, %p1548_p8 }
 0x294   : > { %1558 = shalt.err (!%p1555_p0)
}
 0x295   : > { %1485 = dma.vmem_to_hbm [thread:$0]  (%p1704_p5), %s1069_s28, 16, %s2093_s26, %s1048_s9  }
 0x296   : > { %s261_s20 = scalar_lea.vmem [#allocation4], %s1950_s14  ;;  %s2120_s26 = scalar_lea.hbm %s2167_s6, %s1724_s15 }
 0x297   : > { %s1081_s10 = sshll.u32 %s261_s20, 4  ;;  %s1052_s9 = scalar_lea.sflag [#allocation5], %s1950_s14  ;;  %s2114_s10 = int_to_ptr.vmem [resolvable:$true] %s1081_s10 }
 0x298   : > { %s1559_s13 = scalar_lea.vmem %s2114_s10, 16  ;;  %s1630_s16 = smov [#allocation4]  }
 0x299   : > { %p1560_p1 = scmp.ne.s32.totalorder %s2114_s10, %s1559_s13  ;;  %s1563_s17 = sshll.u32 %s1630_s16, 4  ;;  %s1564_s17 = int_to_ptr.vmem [resolvable:$false] %s1563_s17 }
 0x29a   : > { %s1565_s25 = scalar_lea.vmem %s1564_s17, 32  ;;  %p1566_p4 = scmp.lt.s32.totalorder %s2114_s10, %s1564_s17 }
 0x29b   : > { %p1561_p2 = pnand %p1560_p1, %p1704_p5  ;;  %p1567_p7 = scmp.lt.s32.totalorder %s1565_s25, %s1559_s13 }
 0x29d   : > { %p1562_p3 = pneg %p1561_p2  ;;  %p1568_p8 = por %p1567_p7, %p1566_p4 }
 0x29f   : > { %p1569_p9 = pnand %p1568_p8, %p1562_p3 }
 0x315   : > { %v1031_v54 = vpop.xlane.xlu0 %1030 }
 0x316   : > { %v1032_v18 = vrot.slane %v1031_v54, 4 }
 0x318   : > { %v1033_v55 = vadd.f32 %v1032_v18, %v1031_v54 }
 0x31a   : > { %v1034_v56 = vrot.slane %v1033_v55, 2 }
 0x31c   : > { %v1035_v57 = vadd.f32 %v1034_v56, %v1033_v55 }
 0x31e   : > { %v1036_v11 = vrot.slane %v1035_v57, 1 }
 0x320   : > { %v1037_v58 = vadd.f32 %v1036_v11, %v1035_v57 }
 0x322   : > { %1483 = vpush %v1037_v58 }
 0x353   : > { %s1484_s11 = spop %1483 }
 0x354   : > { %v1039_v59 = vstv %s1484_s11 }
 0x355   : > { %1041 = vst [vmem:[%s261_s20] sm:$0x1] %v1039_v59 }
 0x356   : > { %1572 = shalt.err (!%p1569_p9)
}
 0x357   : > { %s1573_s15 = scalar_lea.hbm %s2120_s26, 16  ;;  %s1577_s19 = scalar_lea.hbm %s2167_s6, 48 }
 0x358   : > { %p1574_p10 = scmp.ne.s32.totalorder %s2120_s26, %s1573_s15  ;;  %p1578_p13 = scmp.lt.u32.totalorder %s2120_s26, %s2167_s6 }
 0x359   : > { %p1579_p0 = scmp.lt.u32.totalorder %s1577_s19, %s1573_s15  ;;  %p1581_p2 = scmp.lt.u32.totalorder %s1573_s15, %s2120_s26 }
 0x35a   : > { %p1575_p11 = pnand %p1574_p10, %p1704_p5 }
 0x35b   : > { %p1580_p1 = por %p1579_p0, %p1578_p13 }
 0x35c   : > { %p1576_p12 = pneg %p1575_p11 }
 0x35d   : > { %p1582_p3 = por %p1581_p2, %p1580_p1 }
 0x35f   : > { %p1583_p4 = pnand %p1582_p3, %p1576_p12 }
 0x361   : > { %1586 = shalt.err (!%p1583_p4)
}
 0x362   : > { %1486 = dma.vmem_to_hbm [thread:$0]  (%p1704_p5), %s2114_s10, 16, %s2120_s26, %s1052_s9  }
 0x363 PF: > { %p1496_p7 = scmp.ge.s32.totalorder %s1625_s24, 2  ;;  %s1101_s11 = sand.u32 1, %s1613_s21  }
 0x364   : > { %s1102_s12 = scalar_lea.sflag [#allocation3], %s1101_s11 }
 0x365   : > { %p1490_p8 = pnand %p1496_p7, %p1708_p6 }
 0x367   : > { %1604 = dma.done.wait (!%p1490_p8), %s1102_s12, 16  }
 0x368   : > { %1606 = vsyncadd (!%p1490_p8), %s1102_s12, 4294967280  ;;  %s1110_s28 = scalar_lea.sflag [#allocation5], %s1101_s11 }
 0x369   : > { %1608 = dma.done.wait (!%p1490_p8), %s1110_s28, 16  }
 0x36a   : > { %1610 = vsyncadd (!%p1490_p8), %s1110_s28, 4294967280  ;;  %p20_p5 = scmp.ge.s32.totalorder %s1691_s27, 5   ;;  %s2170_s21 = smov %s1617_s22 }
 0x36b   : > { %s2171_s22 = smov %s1621_s23  ;;  %s2172_s23 = smov %s1702_s30 }
 0x36c   : > { %s2173_s24 = smov %s1691_s27  ;;  %22 = sbr.rel (!%p20_p5) target bundleno = 5 (0x5), region = 100 }
 0x373   :  { %1114 = vsyncpa [#allocation3], 1 }
 0x374   :  { %1116 = vsyncpa [#allocation3 + $0x1], 1 }
 0x375   :  { %1117 = vsyncpa [#allocation5], 1 }
 0x376   :  { %1119 = vsyncpa [#allocation5 + $0x1], 1 }

</bundles_post_ra>
